<compile_context>
chip_gen: v7x
topology: tpu7x:2x2x1
jax: 0.10.0
libtpu: 0.0.40
codegen_flags: <defaults>
</compile_context>

<pallas_src>
import functools

import jax
import jax.numpy as jnp
from jax.experimental import pallas as pl
from jax.experimental.pallas import tpu as pltpu


def _round_up(x, m):
    return (x + m - 1) // m * m


def critic_kernel(xT_ref, w1_ref, b1_ref, w2_ref, b2_ref, w3_ref, b3_ref, out_ref):
    # xT_ref : (IN, TILE_B)   bf16   (batch on lanes)
    # w1_ref : (HPAD, IN)     bf16   (PyTorch (out, in) layout, hidden padded)
    # b1_ref : (HPAD, 1)      f32
    # w2_ref : (HPAD, HPAD)   bf16
    # b2_ref : (HPAD, 1)      f32
    # w3_ref : (HPAD, 1)      f32
    # b3_ref : (1, 1)         f32
    # out_ref: (1, TILE_B)    f32    (lane-dense value row for this tile)
    xT = xT_ref[...]

    # Layer 1: (HPAD, IN) @ (IN, TILE_B) -> (HPAD, TILE_B), f32 accumulate.
    h1 = jnp.dot(w1_ref[...], xT, preferred_element_type=jnp.float32)
    h1 = jnp.maximum(h1 + b1_ref[...], 0.0)

    # Layer 2: (HPAD, HPAD) @ (HPAD, TILE_B) -> (HPAD, TILE_B).
    h2 = jnp.dot(w2_ref[...], h1.astype(w2_ref.dtype),
                 preferred_element_type=jnp.float32)
    h2 = jnp.maximum(h2 + b2_ref[...], 0.0)

    # Layer 3 (output width 1): VPU multiply + XLU sublane reduce instead of a
    # 1-column matmul; result is already a lane-dense (1, TILE_B) row.
    out_ref[...] = jnp.sum(h2 * w3_ref[...], axis=0, keepdims=True) + b3_ref[...]


def init_params(key, input_size=20, hidden_size=64):
    """PyTorch-convention params: weight (out, in), bias (out,), float32."""
    ks = jax.random.split(key, 6)

    def lin(kw, kb, fan_in, fan_out):
        bound = 1.0 / jnp.sqrt(float(fan_in))
        w = jax.random.uniform(kw, (fan_out, fan_in), jnp.float32, -bound, bound)
        b = jax.random.uniform(kb, (fan_out,), jnp.float32, -bound, bound)
        return w, b

    w1, b1 = lin(ks[0], ks[1], input_size, hidden_size)
    w2, b2 = lin(ks[2], ks[3], hidden_size, hidden_size)
    w3, b3 = lin(ks[4], ks[5], hidden_size, 1)
    return (w1, b1, w2, b2, w3, b3)


def prepare_params(params):
    """Pad hidden dim to 128, cast matmul weights to bf16, shape biases for kernel."""
    w1, b1, w2, b2, w3, b3 = params
    H, IN = w1.shape
    HP = _round_up(H, 128)

    w1p = jnp.zeros((HP, IN), jnp.float32).at[:H, :].set(w1)
    b1p = jnp.zeros((HP, 1), jnp.float32).at[:H, 0].set(b1)
    w2p = jnp.zeros((HP, HP), jnp.float32).at[:H, :H].set(w2)
    b2p = jnp.zeros((HP, 1), jnp.float32).at[:H, 0].set(b2)
    w3p = jnp.zeros((HP, 1), jnp.float32).at[:H, 0].set(w3[0, :])
    b3p = b3.reshape(1, 1).astype(jnp.float32)

    return (w1p.astype(jnp.bfloat16), b1p,
            w2p.astype(jnp.bfloat16), b2p,
            w3p, b3p)


@functools.partial(jax.jit, static_argnames=("tile_b",))
def critic_forward(obs, kernel_params, tile_b=1024):
    """obs: (B, input_size) f32 -> (B,) f32 values. kernel_params from prepare_params."""
    w1, b1, w2, b2, w3, b3 = kernel_params
    B, IN = obs.shape
    HP = w1.shape[0]

    tile_b = min(tile_b, _round_up(B, 128))
    b_pad = _round_up(B, tile_b)
    num_tiles = b_pad // tile_b

    # Lane-major obs: pad batch, transpose to (IN, B_pad), bf16 halves DMA bytes.
    obs_p = jnp.pad(obs, ((0, b_pad - B), (0, 0)))
    xT = obs_p.T.astype(jnp.bfloat16)

    nbytes = lambda a: a.size * a.dtype.itemsize
    cost = pl.CostEstimate(
        flops=2 * b_pad * (IN * HP + HP * HP + HP),
        transcendentals=0,
        bytes_accessed=(nbytes(xT) + nbytes(w1) + nbytes(w2)
                        + nbytes(b1) + nbytes(b2) + nbytes(w3) + nbytes(b3)
                        + b_pad * 4),
    )

    resident = lambda i: (0, 0)  # weights/biases: same block every step -> stay in VMEM
    out = pl.pallas_call(
        critic_kernel,
        out_shape=jax.ShapeDtypeStruct((1, b_pad), jnp.float32),
        grid=(num_tiles,),
        in_specs=[
            pl.BlockSpec((IN, tile_b), lambda i: (0, i)),   # obs tile (pipelined)
            pl.BlockSpec((HP, IN), resident),               # w1
            pl.BlockSpec((HP, 1), resident),                # b1
            pl.BlockSpec((HP, HP), resident),               # w2
            pl.BlockSpec((HP, 1), resident),                # b2
            pl.BlockSpec((HP, 1), resident),                # w3
            pl.BlockSpec((1, 1), resident),                 # b3
        ],
        out_specs=pl.BlockSpec((1, tile_b), lambda i: (0, i)),
        compiler_params=pltpu.CompilerParams(
            dimension_semantics=("parallel",)),
        cost_estimate=cost,
    )(xT, w1, b1, w2, b2, w3, b3)

    # Glue: drop batch padding and flatten -> (B,)  (matches torch .squeeze(-1)).
    return out.reshape(-1)[:B]


if __name__ == "__main__":
    key = jax.random.PRNGKey(0)
    k_obs, k_params = jax.random.split(key)

    input_size, hidden_size, batch = 20, 64, 8
    obs = jax.random.normal(k_obs, (batch, input_size), jnp.float32)

    raw_params = init_params(k_params, input_size, hidden_size)   # PyTorch layout, f32
    kparams = prepare_params(raw_params)                          # padded/bf16 kernel layout

    values = critic_forward(obs, kparams)
    jax.block_until_ready(values)

    # Reference in plain f32 JAX (PyTorch convention: y = x @ W.T + b).
    w1, b1, w2, b2, w3, b3 = raw_params
    h = jnp.maximum(obs @ w1.T + b1, 0.0)
    h = jnp.maximum(h @ w2.T + b2, 0.0)
    ref = (h @ w3.T + b3).squeeze(-1)

    assert values.shape == (batch,)
    # bf16 MXU operands (f32 accumulation) -> compare at bf16-scale tolerance.
    assert jnp.allclose(values, ref, atol=5e-2, rtol=5e-2), (values, ref)

    print("KERNEL_OK")
</pallas_src>

<mosaic_0001>
module attributes {stable_mosaic.version = 11 : i64} {
  func.func @critic_kernel(%arg0: i32, %arg1: memref<20x128xbf16, #tpu.memory_space<vmem>>, %arg2: memref<128x20xbf16, #tpu.memory_space<vmem>>, %arg3: memref<128x1xf32, #tpu.memory_space<vmem>>, %arg4: memref<128x128xbf16, #tpu.memory_space<vmem>>, %arg5: memref<128x1xf32, #tpu.memory_space<vmem>>, %arg6: memref<128x1xf32, #tpu.memory_space<vmem>>, %arg7: memref<1x1xf32, #tpu.memory_space<vmem>>, %arg8: memref<1x128xf32, #tpu.memory_space<vmem>>) attributes {dimension_semantics = [#tpu.dimension_semantics<parallel>], iteration_bounds = array<i64: 1>, scalar_prefetch = 0 : i64, scratch_operands = 0 : i64, tpu.core_type = #tpu.core_type<tc>, window_params = [{transform_indices = @transform_0, window_bounds = array<i64: 20, 128>}, {pipeline_mode = #tpu.pipeline_mode<synchronous>, transform_indices = @transform_1, window_bounds = array<i64: 128, 20>}, {pipeline_mode = #tpu.pipeline_mode<synchronous>, transform_indices = @transform_2, window_bounds = array<i64: 128, 1>}, {pipeline_mode = #tpu.pipeline_mode<synchronous>, transform_indices = @transform_3, window_bounds = array<i64: 128, 128>}, {pipeline_mode = #tpu.pipeline_mode<synchronous>, transform_indices = @transform_4, window_bounds = array<i64: 128, 1>}, {pipeline_mode = #tpu.pipeline_mode<synchronous>, transform_indices = @transform_5, window_bounds = array<i64: 128, 1>}, {pipeline_mode = #tpu.pipeline_mode<synchronous>, transform_indices = @transform_6, window_bounds = array<i64: 1, 1>}, {transform_indices = @transform_7, window_bounds = array<i64: 1, 128>}]} {
    %c0 = arith.constant 0 : index
    %c0_0 = arith.constant 0 : index
    %0 = vector.load %arg1[%c0, %c0_0] : memref<20x128xbf16, #tpu.memory_space<vmem>>, vector<20x128xbf16>
    %c0_1 = arith.constant 0 : index
    %c0_2 = arith.constant 0 : index
    %1 = vector.load %arg2[%c0_1, %c0_2] : memref<128x20xbf16, #tpu.memory_space<vmem>>, vector<128x20xbf16>
    %cst = arith.constant dense<0.000000e+00> : vector<128x128xf32>
    %2 = tpu.matmul %1, %0, %cst {dimension_numbers = #tpu.dot_dimension_numbers<[1], [0], [0], [1], [0, 0, 1, 1], [], []>} : vector<128x20xbf16>, vector<20x128xbf16>, vector<128x128xf32> -> vector<128x128xf32>
    %c0_3 = arith.constant 0 : index
    %c0_4 = arith.constant 0 : index
    %3 = vector.load %arg3[%c0_3, %c0_4] : memref<128x1xf32, #tpu.memory_space<vmem>>, vector<128x1xf32>
    %4 = vector.broadcast %3 : vector<128x1xf32> to vector<128x128xf32>
    %5 = arith.addf %2, %4 : vector<128x128xf32>
    %cst_5 = arith.constant 0.000000e+00 : f32
    %6 = vector.broadcast %cst_5 : f32 to vector<128x128xf32>
    %7 = arith.maximumf %5, %6 : vector<128x128xf32>
    %c0_6 = arith.constant 0 : index
    %c0_7 = arith.constant 0 : index
    %8 = vector.load %arg4[%c0_6, %c0_7] : memref<128x128xbf16, #tpu.memory_space<vmem>>, vector<128x128xbf16>
    %9 = arith.truncf %7 : vector<128x128xf32> to vector<128x128xbf16>
    %cst_8 = arith.constant dense<0.000000e+00> : vector<128x128xf32>
    %10 = tpu.matmul %8, %9, %cst_8 {dimension_numbers = #tpu.dot_dimension_numbers<[1], [0], [0], [1], [0, 0, 1, 1], [], []>} : vector<128x128xbf16>, vector<128x128xbf16>, vector<128x128xf32> -> vector<128x128xf32>
    %c0_9 = arith.constant 0 : index
    %c0_10 = arith.constant 0 : index
    %11 = vector.load %arg5[%c0_9, %c0_10] : memref<128x1xf32, #tpu.memory_space<vmem>>, vector<128x1xf32>
    %12 = vector.broadcast %11 : vector<128x1xf32> to vector<128x128xf32>
    %13 = arith.addf %10, %12 : vector<128x128xf32>
    %cst_11 = arith.constant 0.000000e+00 : f32
    %14 = vector.broadcast %cst_11 : f32 to vector<128x128xf32>
    %15 = arith.maximumf %13, %14 : vector<128x128xf32>
    %c0_12 = arith.constant 0 : index
    %c0_13 = arith.constant 0 : index
    %16 = vector.load %arg6[%c0_12, %c0_13] : memref<128x1xf32, #tpu.memory_space<vmem>>, vector<128x1xf32>
    %17 = vector.broadcast %16 : vector<128x1xf32> to vector<128x128xf32>
    %18 = arith.mulf %15, %17 : vector<128x128xf32>
    %cst_14 = arith.constant dense<0.000000e+00> : vector<128xf32>
    %19 = vector.multi_reduction <add>, %18, %cst_14 [0] : vector<128x128xf32> to vector<128xf32>
    %20 = vector.shape_cast %19 : vector<128xf32> to vector<1x128xf32>
    %c0_15 = arith.constant 0 : index
    %c0_16 = arith.constant 0 : index
    %21 = vector.load %arg7[%c0_15, %c0_16] : memref<1x1xf32, #tpu.memory_space<vmem>>, vector<1x1xf32>
    %22 = vector.broadcast %21 : vector<1x1xf32> to vector<1x128xf32>
    %23 = arith.addf %20, %22 : vector<1x128xf32>
    %c0_17 = arith.constant 0 : index
    %c0_18 = arith.constant 0 : index
    %24 = vector.load %arg8[%c0_17, %c0_18] : memref<1x128xf32, #tpu.memory_space<vmem>>, vector<1x128xf32>
    tpu.vector_store %arg8[%c0_17, %c0_18], %23 {strides = array<i32>} : memref<1x128xf32, #tpu.memory_space<vmem>>, vector<1x128xf32>,
    return
  }
  func.func @transform_0(%arg0: i32) -> (i32, i32) {
    %c0_i32 = arith.constant 0 : i32
    %c0_i32_0 = arith.constant 0 : i32
    return %c0_i32, %arg0 : i32, i32
  }
  func.func @transform_1(%arg0: i32) -> (i32, i32) {
    %c0_i32 = arith.constant 0 : i32
    %c0_i32_0 = arith.constant 0 : i32
    %c0_i32_1 = arith.constant 0 : i32
    return %c0_i32, %c0_i32_0 : i32, i32
  }
  func.func @transform_2(%arg0: i32) -> (i32, i32) {
    %c0_i32 = arith.constant 0 : i32
    %c0_i32_0 = arith.constant 0 : i32
    %c0_i32_1 = arith.constant 0 : i32
    return %c0_i32, %c0_i32_0 : i32, i32
  }
  func.func @transform_3(%arg0: i32) -> (i32, i32) {
    %c0_i32 = arith.constant 0 : i32
    %c0_i32_0 = arith.constant 0 : i32
    %c0_i32_1 = arith.constant 0 : i32
    return %c0_i32, %c0_i32_0 : i32, i32
  }
  func.func @transform_4(%arg0: i32) -> (i32, i32) {
    %c0_i32 = arith.constant 0 : i32
    %c0_i32_0 = arith.constant 0 : i32
    %c0_i32_1 = arith.constant 0 : i32
    return %c0_i32, %c0_i32_0 : i32, i32
  }
  func.func @transform_5(%arg0: i32) -> (i32, i32) {
    %c0_i32 = arith.constant 0 : i32
    %c0_i32_0 = arith.constant 0 : i32
    %c0_i32_1 = arith.constant 0 : i32
    return %c0_i32, %c0_i32_0 : i32, i32
  }
  func.func @transform_6(%arg0: i32) -> (i32, i32) {
    %c0_i32 = arith.constant 0 : i32
    %c0_i32_0 = arith.constant 0 : i32
    %c0_i32_1 = arith.constant 0 : i32
    return %c0_i32, %c0_i32_0 : i32, i32
  }
  func.func @transform_7(%arg0: i32) -> (i32, i32) {
    %c0_i32 = arith.constant 0 : i32
    %c0_i32_0 = arith.constant 0 : i32
    return %c0_i32, %arg0 : i32, i32
  }
}

</mosaic_0001>

<bundles_post_ra>
// kernel: critic_forward.1
= control target key start
LH: loop header
LB: loop body
LE: loop exit
PB: predicated region body
PF: predicated region fallthrough
CT: control target
= control target key end

     0   :  { %v907_v0 = vmov 0   ;;  %vm218_vm0 = vcmask 1041408   ;;  %vm193_vm1 = vcmask 162816   ;;  %s1160_s2 = inlined_call_operand.vmem [shape: f32[128,1], index: 2, kind: input, shape index: {}]   ;;  %s1161_s0 = inlined_call_operand.vmem [shape: bf16[20,128], index: 0, kind: input, shape index: {}]   ;;  %s1162_s6 = inlined_call_operand.<no memory space> [shape: f32[1,1], index: 6, kind: input, shape index: {}]   ;;  %s1163_s1 = inlined_call_operand.vmem [shape: bf16[128,20], index: 1, kind: input, shape index: {}]   ;;  %s1164_s4 = inlined_call_operand.vmem [shape: f32[128,1], index: 4, kind: input, shape index: {}]   ;;  %s1165_s5 = inlined_call_operand.vmem [shape: f32[128,1], index: 5, kind: input, shape index: {}]   ;;  %s1166_s3 = inlined_call_operand.vmem [shape: bf16[128,128], index: 3, kind: input, shape index: {}]   ;;  %s1167_s7 = inlined_call_operand.vmem [shape: f32[1,128], index: 7, kind: output, shape index: {}]  }
   0x1   :  { %887 = vset.pattern.permute.xlu0 %v907_v0  ;;  %v48_v1 = vld [vmem:[%s1160_s2] sm:$0xff]  ;;  %888 = vset.pattern.permute.xlu1 %v907_v0  ;;  %v12_v2 = vstv %s1162_s6  ;;  %v890_v4 = vld [vmem:[%s1161_s0 + $0x8] ss:$0 sps:$4 sm:$0x33]   ;;  %v50_v6 = vld [vmem:[%s1160_s2 + $0x10] sm:$0xff] }
   0x2   :  { %66 = vperm.xlu0 %887, %v48_v1   ;;  %v889_v3 = vld [vmem:[%s1161_s0] sm:$0xff]   ;;  %13 = vst [vmem:[#allocation2] sm:$0x1] %v12_v2  ;;  %v49_v5 = vld [vmem:[%s1160_s2 + $0x8] sm:$0xff]  ;;  %76 = vperm.xlu1 %888, %v50_v6   ;;  %v51_v7 = vld [vmem:[%s1160_s2 + $0x18] sm:$0xff]  ;;  %v220_v9 = vsel %vm218_vm0, %v890_v4, 0 }
   0x3   :  { %817 = vmatprep.subr.bf16.mxu0 %v889_v3  ;;  %v891_v8 = vld [vmem:[%s1163_s1] sm:$0xff]   ;;  %v892_v11 = vld [vmem:[%s1163_s1 + $0x8] sm:$0xff]   ;;  %v893_v13 = vld [vmem:[%s1163_s1 + $0x10] sm:$0xff]  }
   0x4   :  { %818 = vmatpush3.bf16.msra.mxu0 %v889_v3  ;;  %v52_v10 = vld [vmem:[%s1160_s2 + $0x20] sm:$0xff]  ;;  %821 = vmatprep.mubr.msk.bf16.mxu0 %vm193_vm1, %v891_v8  ;;  %v53_v12 = vld [vmem:[%s1160_s2 + $0x28] sm:$0xff]  ;;  %v54_v14 = vld [vmem:[%s1160_s2 + $0x30] sm:$0xff] }
   0x5   :  { %885 = vmatprep.subr.msk.bf16.mxu0 %vm218_vm0, %v890_v4  ;;  %v55_v15 = vld [vmem:[%s1160_s2 + $0x38] sm:$0xff]  ;;  %v56_v16 = vld [vmem:[%s1160_s2 + $0x40] sm:$0xff]  ;;  %v57_v18 = vld [vmem:[%s1160_s2 + $0x48] sm:$0xff] }
   0x6   :  { %71 = vperm.xlu0 %887, %v49_v5   ;;  %81 = vperm.xlu1 %888, %v51_v7   ;;  %v894_v17 = vld [vmem:[%s1163_s1 + $0x18] sm:$0xff]   ;;  %v895_v19 = vld [vmem:[%s1163_s1 + $0x20] sm:$0xff]   ;;  %v58_v20 = vld [vmem:[%s1160_s2 + $0x50] sm:$0xff] }
   0x7   :  { %v59_v21 = vld [vmem:[%s1160_s2 + $0x58] sm:$0xff]  ;;  %v60_v22 = vld [vmem:[%s1160_s2 + $0x60] sm:$0xff]  ;;  %v896_v23 = vld [vmem:[%s1163_s1 + $0x28] sm:$0xff]  }
   0x8   :  { %820 = vmatpush3.bf16.msra.mxu0 %v220_v9  ;;  %v61_v24 = vld [vmem:[%s1160_s2 + $0x68] sm:$0xff]  ;;  %v897_v25 = vld [vmem:[%s1163_s1 + $0x30] sm:$0xff]   ;;  %v63_v27 = vld [vmem:[%s1160_s2 + $0x78] sm:$0xff] }
   0x9   :  { %v62_v26 = vld [vmem:[%s1160_s2 + $0x70] sm:$0xff]  ;;  %v359_v28 = vld [vmem:[%s1164_s4] sm:$0xff]  ;;  %v898_v29 = vld [vmem:[%s1163_s1 + $0x38] sm:$0xff]  }
   0xa   :  { %86 = vperm.xlu0 %887, %v52_v10   ;;  %91 = vperm.xlu1 %888, %v53_v12   ;;  %v360_v30 = vld [vmem:[%s1164_s4 + $0x8] sm:$0xff]  ;;  %v361_v31 = vld [vmem:[%s1164_s4 + $0x10] sm:$0xff]  ;;  %v362_v32 = vld [vmem:[%s1164_s4 + $0x18] sm:$0xff] }
   0xb   :  { %822 = vmatmul.mubr.msk.bf16.vlgmr.msra.gmra.mrb[0].mxu0 %vm193_vm1, %v892_v11  ;;  %v363_v33 = vld [vmem:[%s1164_s4 + $0x20] sm:$0xff]  ;;  %v364_v34 = vld [vmem:[%s1164_s4 + $0x28] sm:$0xff]  ;;  %v618_v37 = vld [vmem:[%s1165_s5 + $0x10] sm:$0xff] }
   0xc   :  { %825 = vmatprep.mubr.msk.bf16.mxu0 %vm193_vm1, %v893_v13  ;;  %v616_v35 = vld [vmem:[%s1165_s5] sm:$0xff]  ;;  %v617_v36 = vld [vmem:[%s1165_s5 + $0x8] sm:$0xff]  ;;  %v619_v38 = vld [vmem:[%s1165_s5 + $0x18] sm:$0xff] }
   0xd   :  { %v365_v39 = vld [vmem:[%s1164_s4 + $0x30] sm:$0xff]  ;;  %v620_v40 = vld [vmem:[%s1165_s5 + $0x20] sm:$0xff]  ;;  %v366_v41 = vld [vmem:[%s1164_s4 + $0x38] sm:$0xff] }
   0xe   :  { %96 = vperm.xlu0 %887, %v54_v14   ;;  %101 = vperm.xlu1 %888, %v55_v15   ;;  %v621_v42 = vld [vmem:[%s1165_s5 + $0x28] sm:$0xff]  ;;  %v367_v43 = vld [vmem:[%s1164_s4 + $0x40] sm:$0xff]  ;;  %v622_v44 = vld [vmem:[%s1165_s5 + $0x30] sm:$0xff] }
   0xf   :  { %v368_v45 = vld [vmem:[%s1164_s4 + $0x48] sm:$0xff]  ;;  %v623_v46 = vld [vmem:[%s1165_s5 + $0x38] sm:$0xff]  ;;  %v369_v47 = vld [vmem:[%s1164_s4 + $0x50] sm:$0xff] }
  0x10   :  { %v624_v48 = vld [vmem:[%s1165_s5 + $0x40] sm:$0xff]  ;;  %v370_v49 = vld [vmem:[%s1164_s4 + $0x58] sm:$0xff]  ;;  %v625_v50 = vld [vmem:[%s1165_s5 + $0x48] sm:$0xff] }
  0x11   :  { %v371_v51 = vld [vmem:[%s1164_s4 + $0x60] sm:$0xff]  ;;  %v626_v52 = vld [vmem:[%s1165_s5 + $0x50] sm:$0xff]  ;;  %v372_v53 = vld [vmem:[%s1164_s4 + $0x68] sm:$0xff] }
  0x12   :  { %106 = vperm.xlu0 %887, %v56_v16   ;;  %111 = vperm.xlu1 %888, %v57_v18   ;;  %v627_v54 = vld [vmem:[%s1165_s5 + $0x58] sm:$0xff]  ;;  %v373_v55 = vld [vmem:[%s1164_s4 + $0x70] sm:$0xff]  ;;  %v628_v56 = vld [vmem:[%s1165_s5 + $0x60] sm:$0xff] }
  0x13   :  { %826 = vmatmul.mubr.msk.bf16.gmra.mrb[4].mxu0 %vm193_vm1, %v894_v17  ;;  %v374_v57 = vld [vmem:[%s1164_s4 + $0x78] sm:$0xff]  ;;  %v629_v58 = vld [vmem:[%s1165_s5 + $0x68] sm:$0xff]  ;;  %v630_v59 = vld [vmem:[%s1165_s5 + $0x70] sm:$0xff] }
  0x14   :  { %829 = vmatprep.mubr.msk.bf16.mxu0 %vm193_vm1, %v895_v19  ;;  %v631_v60 = vld [vmem:[%s1165_s5 + $0x78] sm:$0xff]  ;;  %v749_v61 = vld [vmem:[#allocation2] sm:$0x1]  ;;  %v900_v63 = vld [vmem:[%s1166_s3 + $0x10] sm:$0xff]  }
  0x15   :  { %v899_v62 = vld [vmem:[%s1166_s3] sm:$0xff]   ;;  %857 = vmatprep.mubr.bf16.mxu1 %v900_v63 }
  0x16   :  { %116 = vperm.xlu0 %887, %v58_v20   ;;  %121 = vperm.xlu1 %888, %v59_v21  }
  0x1a   :  { %126 = vperm.xlu0 %887, %v60_v22   ;;  %131 = vperm.xlu1 %888, %v61_v24  }
  0x1b   :  { %830 = vmatmul.mubr.msk.bf16.gmra.mrb[8].mxu0 %vm193_vm1, %v896_v23 }
  0x1c   :  { %833 = vmatprep.mubr.msk.bf16.mxu0 %vm193_vm1, %v897_v25 }
  0x1e   :  { %136 = vperm.xlu0 %887, %v62_v26   ;;  %141 = vperm.xlu1 %888, %v63_v27  }
  0x22   :  { %377 = vperm.xlu0 %887, %v359_v28   ;;  %382 = vperm.xlu1 %888, %v360_v30  }
  0x23   :  { %834 = vmatmul.mubr.msk.bf16.gmra.mrb[12].mxu0 %vm193_vm1, %v898_v29 }
  0x24   :  { %853 = vmatprep.mubr.bf16.mxu0 %v899_v62 }
  0x26   :  { %387 = vperm.xlu0 %887, %v361_v31   ;;  %392 = vperm.xlu1 %888, %v362_v32  }
  0x2a   :  { %397 = vperm.xlu0 %887, %v363_v33   ;;  %402 = vperm.xlu1 %888, %v364_v34  }
  0x2e   :  { %634 = vperm.xlu0 %887, %v616_v35   ;;  %639 = vperm.xlu1 %888, %v617_v36  }
  0x32   :  { %644 = vperm.xlu0 %887, %v618_v37   ;;  %649 = vperm.xlu1 %888, %v619_v38  }
  0x36   :  { %407 = vperm.xlu0 %887, %v365_v39   ;;  %654 = vperm.xlu1 %888, %v620_v40  }
  0x3a   :  { %412 = vperm.xlu0 %887, %v366_v41   ;;  %659 = vperm.xlu1 %888, %v621_v42  }
  0x3e   :  { %417 = vperm.xlu0 %887, %v367_v43   ;;  %664 = vperm.xlu1 %888, %v622_v44  }
  0x42   :  { %422 = vperm.xlu0 %887, %v368_v45   ;;  %669 = vperm.xlu1 %888, %v623_v46  }
  0x46   :  { %427 = vperm.xlu0 %887, %v369_v47   ;;  %674 = vperm.xlu1 %888, %v624_v48  }
  0x4a   :  { %432 = vperm.xlu0 %887, %v370_v49   ;;  %679 = vperm.xlu1 %888, %v625_v50  }
  0x4e   :  { %437 = vperm.xlu0 %887, %v371_v51   ;;  %684 = vperm.xlu1 %888, %v626_v52  }
  0x52   :  { %442 = vperm.xlu0 %887, %v372_v53   ;;  %689 = vperm.xlu1 %888, %v627_v54  }
  0x56   :  { %447 = vperm.xlu0 %887, %v373_v55   ;;  %694 = vperm.xlu1 %888, %v628_v56  }
  0x5a   :  { %452 = vperm.xlu0 %887, %v374_v57   ;;  %699 = vperm.xlu1 %888, %v629_v58  }
  0x5e   :  { %704 = vperm.xlu0 %887, %v630_v59   ;;  %709 = vperm.xlu1 %888, %v631_v60  }
  0x62   :  { %752 = vperm.xlu0 %887, %v749_v61  }
  0x81   :  { %v67_v0 = vpop.permute.xlu0 %66  ;;  %v77_v1 = vpop.permute.xlu1 %76 }
  0x85   :  { %v72_v2 = vpop.permute.xlu0 %71  ;;  %v82_v3 = vpop.permute.xlu1 %81 }
  0x89   :  { %v87_v4 = vpop.permute.xlu0 %86  ;;  %v92_v5 = vpop.permute.xlu1 %91 }
  0x8d   :  { %v97_v6 = vpop.permute.xlu0 %96  ;;  %v102_v10 = vpop.permute.xlu1 %101 }
  0x91   :  { %v107_v18 = vpop.permute.xlu0 %106  ;;  %v112_v22 = vpop.permute.xlu1 %111 }
  0x95   :  { %v117_v31 = vpop.permute.xlu0 %116  ;;  %v122_v35 = vpop.permute.xlu1 %121 }
  0x99   :  { %v127_v43 = vpop.permute.xlu0 %126  ;;  %v132_v48 = vpop.permute.xlu1 %131 }
  0x9d   :  { %v137_v55 = vpop.permute.xlu0 %136  ;;  %v142_v60 = vpop.permute.xlu1 %141 }
  0xde   :  { %v823_v7 = vpop.f32.mrb[0].mxu0 }
  0xdf   :  { %v265_v8 = vadd.f32 %v823_v7, %v77_v1  ;;  %v256_v9 = vpop.f32.mrb[1].mxu0 }
  0xe0   :  { %v257_v11 = vadd.f32 %v256_v9, %v67_v0  ;;  %v824_v12 = vpop.f32.mrb[2].mxu0  ;;  %v902_v9 = vld [vmem:[%s1166_s3 + $0x18] sm:$0xff]  }
  0xe1   :  { %v268_v13 = vadd.f32 %v824_v12, %v82_v3  ;;  %v259_v14 = vpop.f32.mrb[3].mxu0  ;;  %v321_v16 = vmax.f32 %v265_v8, 0.0  ;;  %v901_v8 = vld [vmem:[%s1166_s3 + $0x8] sm:$0xff]   ;;  %v905_v12 = vld [vmem:[%s1166_s3 + $0x30] sm:$0xff]  }
  0xe2   :  { %v260_v15 = vadd.f32 %v259_v14, %v72_v2  ;;  %v319_v19 = vmax.f32 %v257_v11, 0.0  ;;  %v904_v11 = vld [vmem:[%s1166_s3 + $0x28] sm:$0xff]   ;;  %v378_v14 = vpop.permute.xlu0 %377 }
  0xe3   :  { %v322_v17 = vmax.f32 %v268_v13, 0.0  ;;  %v906_v13 = vld [vmem:[%s1166_s3 + $0x38] sm:$0xff]  }
  0xe4   :  { %v320_v20 = vmax.f32 %v260_v15, 0.0 }
  0xe5   :  { %v352_v21 = vpack.c.bf16 %v322_v17, %v321_v16  ;;  %v383_v16 = vpop.permute.xlu1 %382 }
  0xe6   :  { %v351_v23 = vpack.c.bf16 %v320_v20, %v319_v19  ;;  %v827_v24 = vpop.f32.mrb[4].mxu0  ;;  %v388_v15 = vpop.permute.xlu0 %387 }
  0xe7   :  { %v281_v25 = vadd.f32 %v827_v24, %v97_v6  ;;  %v272_v26 = vpop.f32.mrb[5].mxu0 }
  0xe8   :  { %v273_v27 = vadd.f32 %v272_v26, %v87_v4  ;;  %v828_v28 = vpop.f32.mrb[6].mxu0  ;;  %837 = vmatprep.subr.bf16.mxu0 %v351_v23  ;;  %869 = vmatprep.subr.bf16.mxu1 %v351_v23 }
  0xe9   :  { %v284_v29 = vadd.f32 %v828_v28, %v102_v10  ;;  %v275_v30 = vpop.f32.mrb[7].mxu0  ;;  %838 = vmatpush3.bf16.msra.mxu0 %v351_v23  ;;  %877 = vmatpush3.bf16.msra.mxu1 %v351_v23  ;;  %v325_v33 = vmax.f32 %v281_v25, 0.0  ;;  %v903_v10 = vld [vmem:[%s1166_s3 + $0x20] sm:$0xff]  }
  0xea   :  { %v276_v32 = vadd.f32 %v275_v30, %v92_v5  ;;  %839 = vmatprep.subr.bf16.mxu0 %v352_v21  ;;  %870 = vmatprep.subr.bf16.mxu1 %v352_v21  ;;  %v323_v36 = vmax.f32 %v273_v27, 0.0  ;;  %v398_v17 = vpop.permute.xlu0 %397 }
  0xeb   :  { %v326_v34 = vmax.f32 %v284_v29, 0.0 }
  0xec   :  { %v324_v37 = vmax.f32 %v276_v32, 0.0 }
  0xed   :  { %v354_v38 = vpack.c.bf16 %v326_v34, %v325_v33  ;;  %840 = vmatpush3.bf16.msra.mxu0 %v352_v21  ;;  %878 = vmatpush3.bf16.msra.mxu1 %v352_v21 }
  0xee   :  { %v353_v39 = vpack.c.bf16 %v324_v37, %v323_v36  ;;  %v831_v40 = vpop.f32.mrb[8].mxu0  ;;  %v635_v19 = vpop.permute.xlu0 %634 }
  0xef   :  { %v297_v41 = vadd.f32 %v831_v40, %v117_v31  ;;  %v288_v42 = vpop.f32.mrb[9].mxu0 }
  0xf0   :  { %v289_v44 = vadd.f32 %v288_v42, %v107_v18  ;;  %v832_v45 = vpop.f32.mrb[10].mxu0  ;;  %841 = vmatprep.subr.bf16.mxu0 %v353_v39  ;;  %871 = vmatprep.subr.bf16.mxu1 %v353_v39  ;;  %v393_v18 = vpop.permute.xlu1 %392 }
  0xf1   :  { %v300_v46 = vadd.f32 %v832_v45, %v122_v35  ;;  %v291_v47 = vpop.f32.mrb[11].mxu0  ;;  %842 = vmatpush3.bf16.msra.mxu0 %v353_v39  ;;  %879 = vmatpush3.bf16.msra.mxu1 %v353_v39  ;;  %v329_v50 = vmax.f32 %v297_v41, 0.0 }
  0xf2   :  { %v292_v49 = vadd.f32 %v291_v47, %v112_v22  ;;  %843 = vmatprep.subr.bf16.mxu0 %v354_v38  ;;  %872 = vmatprep.subr.bf16.mxu1 %v354_v38  ;;  %v327_v52 = vmax.f32 %v289_v44, 0.0  ;;  %v645_v21 = vpop.permute.xlu0 %644 }
  0xf3   :  { %v330_v51 = vmax.f32 %v300_v46, 0.0 }
  0xf4   :  { %v328_v53 = vmax.f32 %v292_v49, 0.0  ;;  %v403_v20 = vpop.permute.xlu1 %402 }
  0xf5   :  { %v356_v54 = vpack.c.bf16 %v330_v51, %v329_v50  ;;  %844 = vmatpush3.bf16.msra.mxu0 %v354_v38  ;;  %880 = vmatpush3.bf16.msra.mxu1 %v354_v38 }
  0xf6   :  { %v355_v56 = vpack.c.bf16 %v328_v53, %v327_v52  ;;  %v835_v57 = vpop.f32.mrb[12].mxu0  ;;  %v408_v23 = vpop.permute.xlu0 %407 }
  0xf7   :  { %v313_v58 = vadd.f32 %v835_v57, %v137_v55  ;;  %v304_v59 = vpop.f32.mrb[13].mxu0 }
  0xf8   :  { %v305_v61 = vadd.f32 %v304_v59, %v127_v43  ;;  %v836_v62 = vpop.f32.mrb[14].mxu0  ;;  %845 = vmatprep.subr.bf16.mxu0 %v355_v56  ;;  %873 = vmatprep.subr.bf16.mxu1 %v355_v56  ;;  %v640_v22 = vpop.permute.xlu1 %639 }
  0xf9   :  { %v316_v63 = vadd.f32 %v836_v62, %v142_v60  ;;  %v307_v0 = vpop.f32.mrb[15].mxu0  ;;  %846 = vmatpush3.bf16.msra.mxu0 %v355_v56  ;;  %881 = vmatpush3.bf16.msra.mxu1 %v355_v56  ;;  %v333_v2 = vmax.f32 %v313_v58, 0.0 }
  0xfa   :  { %v308_v1 = vadd.f32 %v307_v0, %v132_v48  ;;  %847 = vmatprep.subr.bf16.mxu0 %v356_v54  ;;  %874 = vmatprep.subr.bf16.mxu1 %v356_v54  ;;  %v331_v4 = vmax.f32 %v305_v61, 0.0  ;;  %v413_v25 = vpop.permute.xlu0 %412 }
  0xfb   :  { %v334_v3 = vmax.f32 %v316_v63, 0.0 }
  0xfc   :  { %v332_v5 = vmax.f32 %v308_v1, 0.0  ;;  %v650_v24 = vpop.permute.xlu1 %649 }
  0xfd   :  { %v358_v6 = vpack.c.bf16 %v334_v3, %v333_v2  ;;  %848 = vmatpush3.bf16.msra.mxu0 %v356_v54  ;;  %882 = vmatpush3.bf16.msra.mxu1 %v356_v54 }
  0xfe   :  { %v357_v7 = vpack.c.bf16 %v332_v5, %v331_v4  ;;  %v418_v27 = vpop.permute.xlu0 %417 }
 0x100   :  { %849 = vmatprep.subr.bf16.mxu0 %v357_v7  ;;  %875 = vmatprep.subr.bf16.mxu1 %v357_v7  ;;  %v655_v26 = vpop.permute.xlu1 %654 }
 0x101   :  { %850 = vmatpush3.bf16.msra.mxu0 %v357_v7  ;;  %883 = vmatpush3.bf16.msra.mxu1 %v357_v7 }
 0x102   :  { %851 = vmatprep.subr.bf16.mxu0 %v358_v6  ;;  %876 = vmatprep.subr.bf16.mxu1 %v358_v6  ;;  %v423_v29 = vpop.permute.xlu0 %422 }
 0x104   :  { %v660_v28 = vpop.permute.xlu1 %659 }
 0x105   :  { %852 = vmatpush3.bf16.msra.mxu0 %v358_v6  ;;  %884 = vmatpush3.bf16.msra.mxu1 %v358_v6 }
 0x106   :  { %v428_v31 = vpop.permute.xlu0 %427 }
 0x108   :  { %854 = vmatmul.mubr.bf16.vlgmr.msra.gmra.mrb[16].mxu0 %v901_v8  ;;  %858 = vmatmul.mubr.bf16.vlgmr.msra.gmra.mrb[0].mxu1 %v902_v9  ;;  %v665_v30 = vpop.permute.xlu1 %664 }
 0x109   :  { %861 = vmatprep.mubr.bf16.mxu1 %v903_v10 }
 0x10a   :  { %v433_v33 = vpop.permute.xlu0 %432 }
 0x10c   :  { %v670_v32 = vpop.permute.xlu1 %669 }
 0x10e   :  { %v438_v57 = vpop.permute.xlu0 %437 }
 0x110   :  { %862 = vmatmul.mubr.bf16.gmra.mrb[4].mxu1 %v904_v11  ;;  %v675_v34 = vpop.permute.xlu1 %674 }
 0x111   :  { %865 = vmatprep.mubr.bf16.mxu1 %v905_v12 }
 0x112   :  { %v443_v10 = vpop.permute.xlu0 %442 }
 0x114   :  { %v680_v48 = vpop.permute.xlu1 %679 }
 0x118   :  { %866 = vmatmul.mubr.bf16.gmra.mrb[8].mxu1 %v906_v13  ;;  %v685_v0 = vpop.permute.xlu1 %684 }
 0x1db   :  { %v855_v35 = vpop.f32.mrb[16].mxu0  ;;  %v859_v36 = vpop.f32.mrb[0].mxu1 }
 0x1dc   :  { %v537_v37 = vpop.f32.mrb[17].mxu0  ;;  %v553_v38 = vpop.f32.mrb[1].mxu1  ;;  %v546_v39 = vadd.f32 %v855_v35, %v388_v15  ;;  %v562_v60 = vadd.f32 %v859_v36, %v408_v23 }
 0x1dd   :  { %v538_v40 = vadd.f32 %v537_v37, %v378_v14  ;;  %v856_v41 = vpop.f32.mrb[18].mxu0  ;;  %v860_v42 = vpop.f32.mrb[2].mxu1  ;;  %v554_v50 = vadd.f32 %v553_v38, %v398_v17 }
 0x1de   :  { %v540_v43 = vpop.f32.mrb[19].mxu0  ;;  %v556_v44 = vpop.f32.mrb[3].mxu1  ;;  %v549_v46 = vadd.f32 %v856_v41, %v393_v18  ;;  %v602_v49 = vmax.f32 %v546_v39, 0.0  ;;  %v565_v3 = vadd.f32 %v860_v42, %v413_v25  ;;  %v606_v6 = vmax.f32 %v562_v60, 0.0 }
 0x1df   :  { %v600_v45 = vmax.f32 %v538_v40, 0.0  ;;  %v541_v47 = vadd.f32 %v540_v43, %v383_v16  ;;  %v557_v55 = vadd.f32 %v556_v44, %v403_v20  ;;  %v604_v61 = vmax.f32 %v554_v50, 0.0  ;;  %v690_v16 = vpop.permute.xlu1 %689  ;;  %v448_v36 = vpop.permute.xlu0 %447 }
 0x1e0   :  { %v603_v53 = vmax.f32 %v549_v46, 0.0  ;;  %v714_v59 = vmul.f32 %v645_v21, %v602_v49  ;;  %v607_v11 = vmax.f32 %v565_v3, 0.0  ;;  %v718_v18 = vmul.f32 %v665_v30, %v606_v6 }
 0x1e1   :  { %v601_v51 = vmax.f32 %v541_v47, 0.0  ;;  %v712_v52 = vmul.f32 %v635_v19, %v600_v45  ;;  %v605_v5 = vmax.f32 %v557_v55, 0.0  ;;  %v716_v7 = vmul.f32 %v655_v26, %v604_v61 }
 0x1e2   :  { %v715_v2 = vmul.f32 %v650_v24, %v603_v53  ;;  %v719_v24 = vmul.f32 %v670_v32, %v607_v11  ;;  %v755_v60 = vlaneseq }
 0x1e3   :  { %v713_v54 = vmul.f32 %v640_v22, %v601_v51  ;;  %v863_v56 = vpop.f32.mrb[4].mxu1  ;;  %v717_v12 = vmul.f32 %v660_v28, %v605_v5  ;;  %v695_v39 = vpop.permute.xlu1 %694 }
 0x1e4   :  { %v569_v58 = vpop.f32.mrb[5].mxu1  ;;  %v578_v20 = vadd.f32 %v863_v56, %v428_v31  ;;  %v453_v45 = vpop.permute.xlu0 %452 }
 0x1e5   :  { %v728_v62 = vadd.f32 %v713_v54, %v712_v52  ;;  %v864_v63 = vpop.f32.mrb[6].mxu1  ;;  %v570_v9 = vadd.f32 %v569_v58, %v418_v27 }
 0x1e6   :  { %v572_v1 = vpop.f32.mrb[7].mxu1  ;;  %v581_v35 = vadd.f32 %v864_v63, %v433_v33  ;;  %v610_v27 = vmax.f32 %v578_v20, 0.0  ;;  %v756_v63 = vshrl.u32 %v755_v60, 7 }
 0x1e7   :  { %v729_v4 = vadd.f32 %v728_v62, %v714_v59  ;;  %v573_v14 = vadd.f32 %v572_v1, %v423_v29  ;;  %v608_v21 = vmax.f32 %v570_v9, 0.0  ;;  %v700_v49 = vpop.permute.xlu1 %699 }
 0x1e8   :  { %v611_v40 = vmax.f32 %v581_v35, 0.0  ;;  %v722_v30 = vmul.f32 %v685_v0, %v610_v27  ;;  %v705_v55 = vpop.permute.xlu0 %704 }
 0x1e9   :  { %v730_v8 = vadd.f32 %v729_v4, %v715_v2  ;;  %v609_v26 = vmax.f32 %v573_v14, 0.0  ;;  %v720_v37 = vmul.f32 %v675_v34, %v608_v21  ;;  %v757_v2 = vsub.s32 0, %v756_v63 }
 0x1ea   :  { %v723_v46 = vmul.f32 %v690_v16, %v611_v40 }
 0x1eb   :  { %v731_v13 = vadd.f32 %v730_v8, %v716_v7  ;;  %v867_v15 = vpop.f32.mrb[8].mxu1  ;;  %v721_v41 = vmul.f32 %v680_v48, %v609_v26 }
 0x1ec   :  { %v585_v17 = vpop.f32.mrb[9].mxu1  ;;  %v594_v31 = vadd.f32 %v867_v15, %v448_v36  ;;  %v753_v4 = vpop.permute.xlu0 %752 }
 0x1ed   :  { %v732_v19 = vadd.f32 %v731_v13, %v717_v12  ;;  %v868_v22 = vpop.f32.mrb[10].mxu1  ;;  %v586_v28 = vadd.f32 %v585_v17, %v438_v57  ;;  %v710_v57 = vpop.permute.xlu1 %709  ;;  %v758_v6 = vrot.slane %v753_v4, %v757_v2 }
 0x1ee   :  { %v588_v23 = vpop.f32.mrb[11].mxu1  ;;  %v597_v47 = vadd.f32 %v868_v22, %v453_v45  ;;  %v614_v50 = vmax.f32 %v594_v31, 0.0 }
 0x1ef   :  { %v733_v25 = vadd.f32 %v732_v19, %v718_v18  ;;  %v589_v42 = vadd.f32 %v588_v23, %v443_v10  ;;  %v612_v44 = vmax.f32 %v586_v28, 0.0 }
 0x1f0   :  { %v615_v53 = vmax.f32 %v597_v47, 0.0  ;;  %v726_v56 = vmul.f32 %v705_v55, %v614_v50 }
 0x1f1   :  { %v734_v38 = vadd.f32 %v733_v25, %v719_v24  ;;  %v613_v33 = vmax.f32 %v589_v42, 0.0  ;;  %v724_v51 = vmul.f32 %v695_v39, %v612_v44 }
 0x1f2   :  { %v727_v58 = vmul.f32 %v710_v57, %v615_v53 }
 0x1f3   :  { %v735_v29 = vadd.f32 %v734_v38, %v720_v37  ;;  %v725_v54 = vmul.f32 %v700_v49, %v613_v33 }
 0x1f5   :  { %v736_v43 = vadd.f32 %v735_v29, %v721_v41 }
 0x1f7   :  { %v737_v32 = vadd.f32 %v736_v43, %v722_v30 }
 0x1f9   :  { %v738_v34 = vadd.f32 %v737_v32, %v723_v46 }
 0x1fb   :  { %v739_v52 = vadd.f32 %v738_v34, %v724_v51 }
 0x1fd   :  { %v740_v48 = vadd.f32 %v739_v52, %v725_v54 }
 0x1ff   :  { %v741_v59 = vadd.f32 %v740_v48, %v726_v56 }
 0x201   :  { %v742_v61 = vadd.f32 %v741_v59, %v727_v58 }
 0x203   :  { %v743_v62 = vrot.slane %v742_v61, 4 }
 0x205   :  { %v744_v0 = vadd.f32 %v743_v62, %v742_v61 }
 0x207   :  { %v745_v1 = vrot.slane %v744_v0, 2 }
 0x209   :  { %v746_v3 = vadd.f32 %v745_v1, %v744_v0 }
 0x20b   :  { %v747_v5 = vrot.slane %v746_v3, 1 }
 0x20d   :  { %v748_v7 = vadd.f32 %v747_v5, %v746_v3 }
 0x20f   :  { %v759_v8 = vadd.f32 %v758_v6, %v748_v7 }
 0x211   :  { %760 = vst [vmem:[%s1167_s7] sm:$0x1] %v759_v8 }

</bundles_post_ra>
